<compile_context>
chip_gen: v7x
topology: tpu7x:2x2x1
jax: 0.10.0
libtpu: 0.0.40
codegen_flags: <defaults>
</compile_context>

<pallas_src>
import functools

import numpy as np
import jax
import jax.numpy as jnp
from jax.experimental import pallas as pl
from jax.experimental.pallas import tpu as pltpu


def _round_up(v, m):
    return ((v + m - 1) // m) * m


def protein_attention_kernel(x_ref, w1_ref, b1_ref, w2_ref, b2_ref, out_ref,
                             s_ref, g_ref, *, B, tile_n, n_valid, n_pad):
    """One grid step: MLP over a (B, tile_n, Cin) tile, accumulate s and Gram G."""
    k = pl.program_id(0)
    nk = pl.num_programs(0)

    @pl.when(k == 0)
    def _init():
        s_ref[...] = jnp.zeros_like(s_ref)
        g_ref[...] = jnp.zeros_like(g_ref)

    # --- MLP: Linear -> ReLU -> Linear as 2-D MXU matmuls over all B*tile_n rows ---
    cin = x_ref.shape[-1]
    x2 = x_ref[...].reshape(B * tile_n, cin)          # sublane merge (tile_n % 8 == 0)
    h = jnp.dot(x2, w1_ref[...], preferred_element_type=jnp.float32) + b1_ref[...]
    h = jnp.maximum(h, 0.0)
    z2 = jnp.dot(h, w2_ref[...], preferred_element_type=jnp.float32) + b2_ref[...]
    cout = z2.shape[-1]

    # --- mask rows that only exist because of padding (biases make them nonzero) ---
    if n_pad != n_valid:
        n_local = jax.lax.broadcasted_iota(jnp.int32, (tile_n, cout), 0)
        valid = (k * tile_n + n_local) < n_valid
    else:
        valid = None

    zb_list = []
    for b in range(B):
        zb = z2[b * tile_n:(b + 1) * tile_n, :]        # (tile_n, Cout), sublane-aligned
        if valid is not None:
            zb = jnp.where(valid, zb, 0.0)
        zb_list.append(zb)

    # --- s[b, :] += sum_n z[b, n, :] ---
    s_tile = jnp.concatenate(
        [jnp.sum(zb, axis=0, keepdims=True) for zb in zb_list], axis=0)  # (B, Cout)
    s_ref[...] += s_tile

    # --- G[b, c] += z_b^T z_c  (contract over tile rows; lhs contracted on dim 0) ---
    for b in range(B):
        for c in range(B):
            g_ref[b * B + c] += jax.lax.dot_general(
                zb_list[b], zb_list[c],
                dimension_numbers=(((0,), (0,)), ((), ())),
                preferred_element_type=jnp.float32)

    # --- finalize on the last tile: g[b, c] = s_b^T G[b, c] s_c, then row softmax ---
    @pl.when(k == nk - 1)
    def _finalize():
        s = s_ref[...]                                  # (B, Cout)
        rows = []
        for b in range(B):
            sb = s[b:b + 1, :]                          # (1, Cout)
            vals = []
            for c in range(B):
                sc = s[c:c + 1, :]                      # (1, Cout)
                t = jnp.dot(sb, g_ref[b * B + c],
                            preferred_element_type=jnp.float32)        # (1, Cout)
                vals.append(jnp.sum(t * sc, axis=1, keepdims=True))    # (1, 1)
            rows.append(jnp.concatenate(vals, axis=1))                  # (1, B)
        g = jnp.concatenate(rows, axis=0)                               # (B, B)

        m = jnp.max(g, axis=1, keepdims=True)
        e = jnp.exp(g - m)
        out_ref[...] = e / jnp.sum(e, axis=1, keepdims=True)


def protein_attention(x, params, *, tile_n=None):
    """x: (B, N, in_channels). Returns the (B, B) row-softmax attention matrix (f32).

    The PyTorch module ends with `.to(torch.float64)`; TPU has no native f64 and the
    cast adds no precision, so the widening cast is left to the host-side caller.
    """
    if x.dtype != jnp.float32:
        # mirrors `if x.dtype == torch.float64: x = x.float()`
        x = x.astype(jnp.float32)
    w1, b1, w2, b2 = params
    B, N, Cin = x.shape
    H = w1.shape[-1]
    Cout = w2.shape[-1]

    if tile_n is None:
        # >=1024 rows/step for long sequences; tiny N collapses to one padded tile.
        tile_n = min(1024, _round_up(N, 8))
    tile_n = _round_up(tile_n, 8)

    n_pad = _round_up(N, tile_n)
    if n_pad != N:
        x = jnp.pad(x, ((0, 0), (0, n_pad - N), (0, 0)))
    num_tiles = n_pad // tile_n

    kernel = functools.partial(protein_attention_kernel,
                               B=B, tile_n=tile_n, n_valid=N, n_pad=n_pad)
    return pl.pallas_call(
        kernel,
        out_shape=jax.ShapeDtypeStruct((B, B), jnp.float32),
        grid_spec=pltpu.PrefetchScalarGridSpec(
            num_scalar_prefetch=0,
            grid=(num_tiles,),
            in_specs=[
                pl.BlockSpec((B, tile_n, Cin), lambda k: (0, k, 0)),
                # constant index_maps -> weights/biases DMA'd once, stay resident
                pl.BlockSpec((Cin, H), lambda k: (0, 0)),
                pl.BlockSpec((1, H), lambda k: (0, 0)),
                pl.BlockSpec((H, Cout), lambda k: (0, 0)),
                pl.BlockSpec((1, Cout), lambda k: (0, 0)),
            ],
            out_specs=pl.BlockSpec((B, B), lambda k: (0, 0)),
            scratch_shapes=[
                pltpu.VMEM((B, Cout), jnp.float32),             # s accumulator
                pltpu.VMEM((B * B, Cout, Cout), jnp.float32),   # Gram accumulator
            ],
        ),
        compiler_params=pltpu.CompilerParams(
            dimension_semantics=("arbitrary",),   # N axis is a reduction
        ),
    )(x, w1, b1, w2, b2)


def init_params(key, in_channels, hid_channels, out_channels):
    """Deterministic init mimicking PyTorch nn.Linear default (U[-1/sqrt(fan_in), +])."""
    k1, k2, k3, k4 = jax.random.split(key, 4)
    b1_bound = 1.0 / (in_channels ** 0.5)
    b2_bound = 1.0 / (hid_channels ** 0.5)
    w1 = jax.random.uniform(k1, (in_channels, hid_channels),
                            minval=-b1_bound, maxval=b1_bound, dtype=jnp.float32)
    b1 = jax.random.uniform(k2, (1, hid_channels),
                            minval=-b1_bound, maxval=b1_bound, dtype=jnp.float32)
    w2 = jax.random.uniform(k3, (hid_channels, out_channels),
                            minval=-b2_bound, maxval=b2_bound, dtype=jnp.float32)
    b2 = jax.random.uniform(k4, (1, out_channels),
                            minval=-b2_bound, maxval=b2_bound, dtype=jnp.float32)
    return (w1, b1, w2, b2)


def protein_attention_ref(x, params):
    """Pure-JAX reference using the ORIGINAL formula (bmm(Z, Z^T) then row-sum)."""
    if x.dtype != jnp.float32:
        x = x.astype(jnp.float32)
    w1, b1, w2, b2 = params
    z = jnp.maximum(x @ w1 + b1, 0.0) @ w2 + b2                    # (B, N, Cout)
    zzT = jnp.einsum('bnh,bkh->bnk', z, z)                         # (B, N, N)
    score = jnp.sum(zzT, axis=2)                                   # (B, N)
    g = score @ score.T                                            # (B, B)
    return jax.nn.softmax(g, axis=1)


if __name__ == "__main__":
    # N=12 with tile_n=8 exercises BOTH the streaming accumulation (2 grid steps)
    # and the padded-row masking (rows 12..15 of the padded second tile).
    B, N = 2, 12
    in_channels, hid_channels, out_channels = 16, 32, 16

    key = jax.random.PRNGKey(0)
    kx, kp = jax.random.split(key)

    x = jax.random.normal(kx, (B, N, in_channels), dtype=jnp.float32)
    params = init_params(kp, in_channels, hid_channels, out_channels)

    W = protein_attention(x, params, tile_n=8)
    W = jax.block_until_ready(W)

    W_ref = protein_attention_ref(x, params)
    assert W.shape == (B, B)
    # The streaming rewrite reorders the f32 summation vs. the bmm reference.
    assert jnp.allclose(W, W_ref, rtol=1e-3, atol=1e-5), (W, W_ref)
    assert jnp.allclose(jnp.sum(W, axis=1), 1.0, atol=1e-5)

    # Match the module's final `.to(torch.float64)` at the host edge (TPU has no f64).
    W64 = np.asarray(W, dtype=np.float64)
    assert W64.dtype == np.float64

    print("KERNEL_OK")
</pallas_src>

<mosaic_0001>
module attributes {stable_mosaic.version = 11 : i64} {
  func.func @protein_attention_kernel(%arg0: i32, %arg1: memref<2x8x16xf32, #tpu.memory_space<vmem>>, %arg2: memref<16x32xf32, #tpu.memory_space<vmem>>, %arg3: memref<1x32xf32, #tpu.memory_space<vmem>>, %arg4: memref<32x16xf32, #tpu.memory_space<vmem>>, %arg5: memref<1x16xf32, #tpu.memory_space<vmem>>, %arg6: memref<2x2xf32, #tpu.memory_space<vmem>>, %arg7: memref<2x16xf32, #tpu.memory_space<vmem>>, %arg8: memref<4x16x16xf32, #tpu.memory_space<vmem>>) attributes {dimension_semantics = [#tpu.dimension_semantics<arbitrary>], iteration_bounds = array<i64: 2>, scalar_prefetch = 0 : i64, scratch_operands = 2 : i64, tpu.core_type = #tpu.core_type<tc>, window_params = [{transform_indices = @transform_0, window_bounds = array<i64: 2, 8, 16>}, {pipeline_mode = #tpu.pipeline_mode<synchronous>, transform_indices = @transform_1, window_bounds = array<i64: 16, 32>}, {pipeline_mode = #tpu.pipeline_mode<synchronous>, transform_indices = @transform_2, window_bounds = array<i64: 1, 32>}, {pipeline_mode = #tpu.pipeline_mode<synchronous>, transform_indices = @transform_3, window_bounds = array<i64: 32, 16>}, {pipeline_mode = #tpu.pipeline_mode<synchronous>, transform_indices = @transform_4, window_bounds = array<i64: 1, 16>}, {pipeline_mode = #tpu.pipeline_mode<synchronous>, transform_indices = @transform_5, window_bounds = array<i64: 2, 2>}]} {
    %c0_i32 = arith.constant 0 : i32
    %0 = arith.cmpi eq, %arg0, %c0_i32 : i32
    %1 = arith.extui %0 : i1 to i32
    %c0_i32_0 = arith.constant 0 : i32
    %2 = arith.cmpi ne, %1, %c0_i32_0 : i32
    scf.if %2 {
      %cst_47 = arith.constant 0.000000e+00 : f32
      %68 = vector.broadcast %cst_47 : f32 to vector<2x16xf32>
      %c0_48 = arith.constant 0 : index
      %c0_49 = arith.constant 0 : index
      %69 = vector.load %arg7[%c0_48, %c0_49] : memref<2x16xf32, #tpu.memory_space<vmem>>, vector<2x16xf32>
      tpu.vector_store %arg7[%c0_48, %c0_49], %68 {strides = array<i32>} : memref<2x16xf32, #tpu.memory_space<vmem>>, vector<2x16xf32>,
      %cst_50 = arith.constant 0.000000e+00 : f32
      %70 = vector.broadcast %cst_50 : f32 to vector<4x16x16xf32>
      %c0_51 = arith.constant 0 : index
      %c0_52 = arith.constant 0 : index
      %c0_53 = arith.constant 0 : index
      %71 = vector.load %arg8[%c0_51, %c0_52, %c0_53] : memref<4x16x16xf32, #tpu.memory_space<vmem>>, vector<4x16x16xf32>
      tpu.vector_store %arg8[%c0_51, %c0_52, %c0_53], %70 {strides = array<i32>} : memref<4x16x16xf32, #tpu.memory_space<vmem>>, vector<4x16x16xf32>,
    } else {
    }
    %c0 = arith.constant 0 : index
    %c0_1 = arith.constant 0 : index
    %c0_2 = arith.constant 0 : index
    %3 = vector.load %arg1[%c0, %c0_1, %c0_2] : memref<2x8x16xf32, #tpu.memory_space<vmem>>, vector<2x8x16xf32>
    %4 = vector.shape_cast %3 : vector<2x8x16xf32> to vector<16x16xf32>
    %c0_3 = arith.constant 0 : index
    %c0_4 = arith.constant 0 : index
    %5 = vector.load %arg2[%c0_3, %c0_4] : memref<16x32xf32, #tpu.memory_space<vmem>>, vector<16x32xf32>
    %cst = arith.constant dense<0.000000e+00> : vector<16x32xf32>
    %6 = tpu.matmul %4, %5, %cst {dimension_numbers = #tpu.dot_dimension_numbers<[1], [0], [0], [1], [0, 0, 1, 1], [], []>} : vector<16x16xf32>, vector<16x32xf32>, vector<16x32xf32> -> vector<16x32xf32>
    %c0_5 = arith.constant 0 : index
    %c0_6 = arith.constant 0 : index
    %7 = vector.load %arg3[%c0_5, %c0_6] : memref<1x32xf32, #tpu.memory_space<vmem>>, vector<1x32xf32>
    %8 = vector.broadcast %7 : vector<1x32xf32> to vector<16x32xf32>
    %9 = arith.addf %6, %8 : vector<16x32xf32>
    %cst_7 = arith.constant 0.000000e+00 : f32
    %10 = vector.broadcast %cst_7 : f32 to vector<16x32xf32>
    %11 = arith.maximumf %9, %10 : vector<16x32xf32>
    %c0_8 = arith.constant 0 : index
    %c0_9 = arith.constant 0 : index
    %12 = vector.load %arg4[%c0_8, %c0_9] : memref<32x16xf32, #tpu.memory_space<vmem>>, vector<32x16xf32>
    %cst_10 = arith.constant dense<0.000000e+00> : vector<16x16xf32>
    %13 = tpu.matmul %11, %12, %cst_10 {dimension_numbers = #tpu.dot_dimension_numbers<[1], [0], [0], [1], [0, 0, 1, 1], [], []>} : vector<16x32xf32>, vector<32x16xf32>, vector<16x16xf32> -> vector<16x16xf32>
    %c0_11 = arith.constant 0 : index
    %c0_12 = arith.constant 0 : index
    %14 = vector.load %arg5[%c0_11, %c0_12] : memref<1x16xf32, #tpu.memory_space<vmem>>, vector<1x16xf32>
    %15 = vector.broadcast %14 : vector<1x16xf32> to vector<16x16xf32>
    %16 = arith.addf %13, %15 : vector<16x16xf32>
    %17 = tpu.iota {dimensions = array<i32: 0>} : vector<8x16xi32>
    %c8_i32 = arith.constant 8 : i32
    %18 = arith.muli %arg0, %c8_i32 : i32
    %19 = vector.broadcast %18 : i32 to vector<8x16xi32>
    %20 = arith.addi %19, %17 : vector<8x16xi32>
    %c12_i32 = arith.constant 12 : i32
    %21 = vector.broadcast %c12_i32 : i32 to vector<8x16xi32>
    %22 = arith.cmpi slt, %20, %21 : vector<8x16xi32>
    %23 = vector.extract_strided_slice %16 {offsets = [0, 0], sizes = [8, 16], strides = [1, 1]} : vector<16x16xf32> to vector<8x16xf32>
    %cst_13 = arith.constant 0.000000e+00 : f32
    %24 = vector.broadcast %cst_13 : f32 to vector<8x16xf32>
    %25 = arith.select %22, %23, %24 : vector<8x16xi1>, vector<8x16xf32>
    %26 = vector.extract_strided_slice %16 {offsets = [8, 0], sizes = [8, 16], strides = [1, 1]} : vector<16x16xf32> to vector<8x16xf32>
    %cst_14 = arith.constant 0.000000e+00 : f32
    %27 = vector.broadcast %cst_14 : f32 to vector<8x16xf32>
    %28 = arith.select %22, %26, %27 : vector<8x16xi1>, vector<8x16xf32>
    %cst_15 = arith.constant dense<0.000000e+00> : vector<16xf32>
    %29 = vector.multi_reduction <add>, %25, %cst_15 [0] : vector<8x16xf32> to vector<16xf32>
    %30 = vector.shape_cast %29 : vector<16xf32> to vector<1x16xf32>
    %cst_16 = arith.constant dense<0.000000e+00> : vector<16xf32>
    %31 = vector.multi_reduction <add>, %28, %cst_16 [0] : vector<8x16xf32> to vector<16xf32>
    %32 = vector.shape_cast %31 : vector<16xf32> to vector<1x16xf32>
    %33 = tpu.concatenate %30, %32 in 0 : vector<1x16xf32>, vector<1x16xf32> -> vector<2x16xf32>
    %c0_17 = arith.constant 0 : index
    %c0_18 = arith.constant 0 : index
    %34 = vector.load %arg7[%c0_17, %c0_18] : memref<2x16xf32, #tpu.memory_space<vmem>>, vector<2x16xf32>
    %35 = arith.addf %34, %33 : vector<2x16xf32>
    %c0_19 = arith.constant 0 : index
    %c0_20 = arith.constant 0 : index
    %36 = vector.load %arg7[%c0_19, %c0_20] : memref<2x16xf32, #tpu.memory_space<vmem>>, vector<2x16xf32>
    tpu.vector_store %arg7[%c0_19, %c0_20], %35 {strides = array<i32>} : memref<2x16xf32, #tpu.memory_space<vmem>>, vector<2x16xf32>,
    %c0_21 = arith.constant 0 : index
    %c0_22 = arith.constant 0 : index
    %c0_23 = arith.constant 0 : index
    %37 = vector.load %arg8[%c0_21, %c0_22, %c0_23] : memref<4x16x16xf32, #tpu.memory_space<vmem>>, vector<1x16x16xf32>
    %38 = vector.shape_cast %37 : vector<1x16x16xf32> to vector<16x16xf32>
    %cst_24 = arith.constant dense<0.000000e+00> : vector<16x16xf32>
    %39 = tpu.matmul %25, %25, %cst_24 {dimension_numbers = #tpu.dot_dimension_numbers<[0], [0], [1], [1], [0, 1, 1, 1], [], []>} : vector<8x16xf32>, vector<8x16xf32>, vector<16x16xf32> -> vector<16x16xf32>
    %40 = arith.addf %38, %39 : vector<16x16xf32>
    %c0_25 = arith.constant 0 : index
    %c0_26 = arith.constant 0 : index
    %c0_27 = arith.constant 0 : index
    %41 = vector.load %arg8[%c0_25, %c0_26, %c0_27] : memref<4x16x16xf32, #tpu.memory_space<vmem>>, vector<1x16x16xf32>
    %42 = vector.shape_cast %41 : vector<1x16x16xf32> to vector<16x16xf32>
    %43 = vector.shape_cast %40 : vector<16x16xf32> to vector<1x16x16xf32>
    tpu.vector_store %arg8[%c0_25, %c0_26, %c0_27], %43 {strides = array<i32>} : memref<4x16x16xf32, #tpu.memory_space<vmem>>, vector<1x16x16xf32>,
    %c1 = arith.constant 1 : index
    %c0_28 = arith.constant 0 : index
    %c0_29 = arith.constant 0 : index
    %44 = vector.load %arg8[%c1, %c0_28, %c0_29] : memref<4x16x16xf32, #tpu.memory_space<vmem>>, vector<1x16x16xf32>
    %45 = vector.shape_cast %44 : vector<1x16x16xf32> to vector<16x16xf32>
    %cst_30 = arith.constant dense<0.000000e+00> : vector<16x16xf32>
    %46 = tpu.matmul %25, %28, %cst_30 {dimension_numbers = #tpu.dot_dimension_numbers<[0], [0], [1], [1], [0, 1, 1, 1], [], []>} : vector<8x16xf32>, vector<8x16xf32>, vector<16x16xf32> -> vector<16x16xf32>
    %47 = arith.addf %45, %46 : vector<16x16xf32>
    %c1_31 = arith.constant 1 : index
    %c0_32 = arith.constant 0 : index
    %c0_33 = arith.constant 0 : index
    %48 = vector.load %arg8[%c1_31, %c0_32, %c0_33] : memref<4x16x16xf32, #tpu.memory_space<vmem>>, vector<1x16x16xf32>
    %49 = vector.shape_cast %48 : vector<1x16x16xf32> to vector<16x16xf32>
    %50 = vector.shape_cast %47 : vector<16x16xf32> to vector<1x16x16xf32>
    tpu.vector_store %arg8[%c1_31, %c0_32, %c0_33], %50 {strides = array<i32>} : memref<4x16x16xf32, #tpu.memory_space<vmem>>, vector<1x16x16xf32>,
    %c2 = arith.constant 2 : index
    %c0_34 = arith.constant 0 : index
    %c0_35 = arith.constant 0 : index
    %51 = vector.load %arg8[%c2, %c0_34, %c0_35] : memref<4x16x16xf32, #tpu.memory_space<vmem>>, vector<1x16x16xf32>
    %52 = vector.shape_cast %51 : vector<1x16x16xf32> to vector<16x16xf32>
    %cst_36 = arith.constant dense<0.000000e+00> : vector<16x16xf32>
    %53 = tpu.matmul %28, %25, %cst_36 {dimension_numbers = #tpu.dot_dimension_numbers<[0], [0], [1], [1], [0, 1, 1, 1], [], []>} : vector<8x16xf32>, vector<8x16xf32>, vector<16x16xf32> -> vector<16x16xf32>
    %54 = arith.addf %52, %53 : vector<16x16xf32>
    %c2_37 = arith.constant 2 : index
    %c0_38 = arith.constant 0 : index
    %c0_39 = arith.constant 0 : index
    %55 = vector.load %arg8[%c2_37, %c0_38, %c0_39] : memref<4x16x16xf32, #tpu.memory_space<vmem>>, vector<1x16x16xf32>
    %56 = vector.shape_cast %55 : vector<1x16x16xf32> to vector<16x16xf32>
    %57 = vector.shape_cast %54 : vector<16x16xf32> to vector<1x16x16xf32>
    tpu.vector_store %arg8[%c2_37, %c0_38, %c0_39], %57 {strides = array<i32>} : memref<4x16x16xf32, #tpu.memory_space<vmem>>, vector<1x16x16xf32>,
    %c3 = arith.constant 3 : index
    %c0_40 = arith.constant 0 : index
    %c0_41 = arith.constant 0 : index
    %58 = vector.load %arg8[%c3, %c0_40, %c0_41] : memref<4x16x16xf32, #tpu.memory_space<vmem>>, vector<1x16x16xf32>
    %59 = vector.shape_cast %58 : vector<1x16x16xf32> to vector<16x16xf32>
    %cst_42 = arith.constant dense<0.000000e+00> : vector<16x16xf32>
    %60 = tpu.matmul %28, %28, %cst_42 {dimension_numbers = #tpu.dot_dimension_numbers<[0], [0], [1], [1], [0, 1, 1, 1], [], []>} : vector<8x16xf32>, vector<8x16xf32>, vector<16x16xf32> -> vector<16x16xf32>
    %61 = arith.addf %59, %60 : vector<16x16xf32>
    %c3_43 = arith.constant 3 : index
    %c0_44 = arith.constant 0 : index
    %c0_45 = arith.constant 0 : index
    %62 = vector.load %arg8[%c3_43, %c0_44, %c0_45] : memref<4x16x16xf32, #tpu.memory_space<vmem>>, vector<1x16x16xf32>
    %63 = vector.shape_cast %62 : vector<1x16x16xf32> to vector<16x16xf32>
    %64 = vector.shape_cast %61 : vector<16x16xf32> to vector<1x16x16xf32>
    tpu.vector_store %arg8[%c3_43, %c0_44, %c0_45], %64 {strides = array<i32>} : memref<4x16x16xf32, #tpu.memory_space<vmem>>, vector<1x16x16xf32>,
    %c1_i32 = arith.constant 1 : i32
    %65 = arith.cmpi eq, %arg0, %c1_i32 : i32
    %66 = arith.extui %65 : i1 to i32
    %c0_i32_46 = arith.constant 0 : i32
    %67 = arith.cmpi ne, %66, %c0_i32_46 : i32
    scf.if %67 {
      %c0_47 = arith.constant 0 : index
      %c0_48 = arith.constant 0 : index
      %68 = vector.load %arg7[%c0_47, %c0_48] : memref<2x16xf32, #tpu.memory_space<vmem>>, vector<2x16xf32>
      %69 = vector.extract_strided_slice %68 {offsets = [0, 0], sizes = [1, 16], strides = [1, 1]} : vector<2x16xf32> to vector<1x16xf32>
      %70 = vector.extract_strided_slice %68 {offsets = [0, 0], sizes = [1, 16], strides = [1, 1]} : vector<2x16xf32> to vector<1x16xf32>
      %c0_49 = arith.constant 0 : index
      %c0_50 = arith.constant 0 : index
      %c0_51 = arith.constant 0 : index
      %71 = vector.load %arg8[%c0_49, %c0_50, %c0_51] : memref<4x16x16xf32, #tpu.memory_space<vmem>>, vector<1x16x16xf32>
      %72 = vector.shape_cast %71 : vector<1x16x16xf32> to vector<16x16xf32>
      %cst_52 = arith.constant dense<0.000000e+00> : vector<1x16xf32>
      %73 = tpu.matmul %69, %72, %cst_52 {dimension_numbers = #tpu.dot_dimension_numbers<[1], [0], [0], [1], [0, 0, 1, 1], [], []>} : vector<1x16xf32>, vector<16x16xf32>, vector<1x16xf32> -> vector<1x16xf32>
      %74 = arith.mulf %73, %70 : vector<1x16xf32>
      %cst_53 = arith.constant dense<0.000000e+00> : vector<1xf32>
      %75 = vector.multi_reduction <add>, %74, %cst_53 [1] : vector<1x16xf32> to vector<1xf32>
      %76 = vector.shape_cast %75 : vector<1xf32> to vector<1x1xf32>
      %77 = vector.extract_strided_slice %68 {offsets = [1, 0], sizes = [1, 16], strides = [1, 1]} : vector<2x16xf32> to vector<1x16xf32>
      %c1_54 = arith.constant 1 : index
      %c0_55 = arith.constant 0 : index
      %c0_56 = arith.constant 0 : index
      %78 = vector.load %arg8[%c1_54, %c0_55, %c0_56] : memref<4x16x16xf32, #tpu.memory_space<vmem>>, vector<1x16x16xf32>
      %79 = vector.shape_cast %78 : vector<1x16x16xf32> to vector<16x16xf32>
      %cst_57 = arith.constant dense<0.000000e+00> : vector<1x16xf32>
      %80 = tpu.matmul %69, %79, %cst_57 {dimension_numbers = #tpu.dot_dimension_numbers<[1], [0], [0], [1], [0, 0, 1, 1], [], []>} : vector<1x16xf32>, vector<16x16xf32>, vector<1x16xf32> -> vector<1x16xf32>
      %81 = arith.mulf %80, %77 : vector<1x16xf32>
      %cst_58 = arith.constant dense<0.000000e+00> : vector<1xf32>
      %82 = vector.multi_reduction <add>, %81, %cst_58 [1] : vector<1x16xf32> to vector<1xf32>
      %83 = vector.shape_cast %82 : vector<1xf32> to vector<1x1xf32>
      %84 = tpu.concatenate %76, %83 in 1 : vector<1x1xf32>, vector<1x1xf32> -> vector<1x2xf32>
      %85 = vector.extract_strided_slice %68 {offsets = [1, 0], sizes = [1, 16], strides = [1, 1]} : vector<2x16xf32> to vector<1x16xf32>
      %86 = vector.extract_strided_slice %68 {offsets = [0, 0], sizes = [1, 16], strides = [1, 1]} : vector<2x16xf32> to vector<1x16xf32>
      %c2_59 = arith.constant 2 : index
      %c0_60 = arith.constant 0 : index
      %c0_61 = arith.constant 0 : index
      %87 = vector.load %arg8[%c2_59, %c0_60, %c0_61] : memref<4x16x16xf32, #tpu.memory_space<vmem>>, vector<1x16x16xf32>
      %88 = vector.shape_cast %87 : vector<1x16x16xf32> to vector<16x16xf32>
      %cst_62 = arith.constant dense<0.000000e+00> : vector<1x16xf32>
      %89 = tpu.matmul %85, %88, %cst_62 {dimension_numbers = #tpu.dot_dimension_numbers<[1], [0], [0], [1], [0, 0, 1, 1], [], []>} : vector<1x16xf32>, vector<16x16xf32>, vector<1x16xf32> -> vector<1x16xf32>
      %90 = arith.mulf %89, %86 : vector<1x16xf32>
      %cst_63 = arith.constant dense<0.000000e+00> : vector<1xf32>
      %91 = vector.multi_reduction <add>, %90, %cst_63 [1] : vector<1x16xf32> to vector<1xf32>
      %92 = vector.shape_cast %91 : vector<1xf32> to vector<1x1xf32>
      %93 = vector.extract_strided_slice %68 {offsets = [1, 0], sizes = [1, 16], strides = [1, 1]} : vector<2x16xf32> to vector<1x16xf32>
      %c3_64 = arith.constant 3 : index
      %c0_65 = arith.constant 0 : index
      %c0_66 = arith.constant 0 : index
      %94 = vector.load %arg8[%c3_64, %c0_65, %c0_66] : memref<4x16x16xf32, #tpu.memory_space<vmem>>, vector<1x16x16xf32>
      %95 = vector.shape_cast %94 : vector<1x16x16xf32> to vector<16x16xf32>
      %cst_67 = arith.constant dense<0.000000e+00> : vector<1x16xf32>
      %96 = tpu.matmul %85, %95, %cst_67 {dimension_numbers = #tpu.dot_dimension_numbers<[1], [0], [0], [1], [0, 0, 1, 1], [], []>} : vector<1x16xf32>, vector<16x16xf32>, vector<1x16xf32> -> vector<1x16xf32>
      %97 = arith.mulf %96, %93 : vector<1x16xf32>
      %cst_68 = arith.constant dense<0.000000e+00> : vector<1xf32>
      %98 = vector.multi_reduction <add>, %97, %cst_68 [1] : vector<1x16xf32> to vector<1xf32>
      %99 = vector.shape_cast %98 : vector<1xf32> to vector<1x1xf32>
      %100 = tpu.concatenate %92, %99 in 1 : vector<1x1xf32>, vector<1x1xf32> -> vector<1x2xf32>
      %101 = tpu.concatenate %84, %100 in 0 : vector<1x2xf32>, vector<1x2xf32> -> vector<2x2xf32>
      %cst_69 = arith.constant dense<0xFF800000> : vector<2xf32>
      %102 = vector.multi_reduction <maximumf>, %101, %cst_69 [1] : vector<2x2xf32> to vector<2xf32>
      %103 = vector.shape_cast %102 : vector<2xf32> to vector<2x1xf32>
      %104 = vector.broadcast %103 : vector<2x1xf32> to vector<2x2xf32>
      %105 = arith.subf %101, %104 : vector<2x2xf32>
      %106 = math.exp %105 : vector<2x2xf32>
      %cst_70 = arith.constant dense<0.000000e+00> : vector<2xf32>
      %107 = vector.multi_reduction <add>, %106, %cst_70 [1] : vector<2x2xf32> to vector<2xf32>
      %108 = vector.shape_cast %107 : vector<2xf32> to vector<2x1xf32>
      %109 = vector.broadcast %108 : vector<2x1xf32> to vector<2x2xf32>
      %110 = arith.divf %106, %109 : vector<2x2xf32>
      %c0_71 = arith.constant 0 : index
      %c0_72 = arith.constant 0 : index
      %111 = vector.load %arg6[%c0_71, %c0_72] : memref<2x2xf32, #tpu.memory_space<vmem>>, vector<2x2xf32>
      tpu.vector_store %arg6[%c0_71, %c0_72], %110 {strides = array<i32>} : memref<2x2xf32, #tpu.memory_space<vmem>>, vector<2x2xf32>,
    } else {
    }
    return
  }
  func.func @transform_0(%arg0: i32) -> (i32, i32, i32) {
    %c0_i32 = arith.constant 0 : i32
    %c0_i32_0 = arith.constant 0 : i32
    %c0_i32_1 = arith.constant 0 : i32
    return %c0_i32, %arg0, %c0_i32_0 : i32, i32, i32
  }
  func.func @transform_1(%arg0: i32) -> (i32, i32) {
    %c0_i32 = arith.constant 0 : i32
    %c0_i32_0 = arith.constant 0 : i32
    %c0_i32_1 = arith.constant 0 : i32
    return %c0_i32, %c0_i32_0 : i32, i32
  }
  func.func @transform_2(%arg0: i32) -> (i32, i32) {
    %c0_i32 = arith.constant 0 : i32
    %c0_i32_0 = arith.constant 0 : i32
    %c0_i32_1 = arith.constant 0 : i32
    return %c0_i32, %c0_i32_0 : i32, i32
  }
  func.func @transform_3(%arg0: i32) -> (i32, i32) {
    %c0_i32 = arith.constant 0 : i32
    %c0_i32_0 = arith.constant 0 : i32
    %c0_i32_1 = arith.constant 0 : i32
    return %c0_i32, %c0_i32_0 : i32, i32
  }
  func.func @transform_4(%arg0: i32) -> (i32, i32) {
    %c0_i32 = arith.constant 0 : i32
    %c0_i32_0 = arith.constant 0 : i32
    %c0_i32_1 = arith.constant 0 : i32
    return %c0_i32, %c0_i32_0 : i32, i32
  }
  func.func @transform_5(%arg0: i32) -> (i32, i32) {
    %c0_i32 = arith.constant 0 : i32
    %c0_i32_0 = arith.constant 0 : i32
    %c0_i32_1 = arith.constant 0 : i32
    return %c0_i32, %c0_i32_0 : i32, i32
  }
}

</mosaic_0001>

<bundles_post_ra>
// kernel: tpu_custom_call.1
= control target key start
LH: loop header
LB: loop body
LE: loop exit
PB: predicated region body
PF: predicated region fallthrough
CT: control target
= control target key end

     0   :  { %10 = vsyncpa [#allocation6], 0  ;;  %s1562_s18 = smov 0   ;;  %s1564_s19 = smov 0   ;;  %s1690_s0 = inlined_call_operand.vmem [shape: f32[2,16,16], index: 0, kind: input, shape index: {}]   ;;  %s1691_s1 = inlined_call_operand.vmem [shape: f32[16,32], index: 1, kind: input, shape index: {}]   ;;  %s1692_s2 = inlined_call_operand.vmem [shape: f32[1,32], index: 2, kind: input, shape index: {}]   ;;  %s1693_s3 = inlined_call_operand.vmem [shape: f32[32,16], index: 3, kind: input, shape index: {}]   ;;  %s1694_s4 = inlined_call_operand.vmem [shape: f32[1,16], index: 4, kind: input, shape index: {}]   ;;  %s1695_s5 = inlined_call_operand.hbm [shape: f32[2,2], index: 5, kind: output, shape index: {}]  }
   0x1   :  { %s1566_s20 = smov 0  }
   0x2 LB: > { %s1575_s21 = sadd.s32 4294967295, %s1525_s20   ;;  %s1577_s22 = sadd.s32 1, %s1525_s20   ;;  %s1525_s20 = sphi %s1566_s20, %s1698_s20   ;;  %s1521_s19 = sphi %s1564_s19, %s1697_s19   ;;  %s1517_s18 = sphi %s1562_s18, %s1696_s18  }
   0x3   : > { %s20_s23 = ssub.s32 %s1525_s20, %s1577_s22  ;;  %s23_s24 = sadd.s32 1, %s1521_s19 }
   0x4   : > { %p21_p0 = scmp.eq.s32.totalorder %s20_s23, 0  ;;  %p30_p1 = scmp.ne.s32.totalorder %s1521_s19, %s1517_s18 }
   0x5   : > { %p31_p2 = scmp.eq.s32.totalorder %s1525_s20, 0  ;;  %p1275_p4 = scmp.ge.s32.totalorder %s1525_s20, 2 }
   0x6   : > { %s1584_s25 = scalar_select %p21_p0, %s1521_s19, %s23_s24  }
   0x7   : > { %p32_p3 = por %p31_p2, %p30_p1  ;;  %173 = sbr.rel (%p1275_p4) target bundleno = 21 (0x15), region = 32 }
   0xe   : > { %176 = sbr.rel (!%p32_p3) target bundleno = 21 (0x15), region = 36  ;;  %s178_s26 = sand.u32 (%p32_p3), 1, %s1521_s19  }
   0xf   : > { %s1277_s27 = sshll.u32 (%p32_p3), %s1525_s20, 3  ;;  %s1276_s28 = sshll.u32 (%p32_p3), %s178_s26, 4 }
  0x10   : > { %s182_s6 = scalar_lea.vmem (%p32_p3), %s1690_s0, %s1277_s27  ;;  %s180_s7 = scalar_lea.vmem (%p32_p3), [#allocation4], %s1276_s28 }
  0x11   : > { %v212_v0 = vld [vmem:[%s182_s6] sm:$0xff] (%p32_p3)  ;;  %v214_v1 = vld [vmem:[%s182_s6 + $0x10] sm:$0xff] (%p32_p3) }
  0x12   : > { %213 = vst [vmem:[%s180_s7] sm:$0xff] (%p32_p3), %v212_v0  ;;  %215 = vst [vmem:[%s180_s7 + $0x8] sm:$0xff] (%p32_p3), %v214_v1 }
  0x15 PF: > { %p1278_p5 = scmp.ge.s32.totalorder %s1525_s20, 1  ;;  %p220_p6 = scmp.lt.s32.totalorder %s1525_s20, 3 }
  0x17   : > { %p221_p7 = pnand %p1278_p5, %p220_p6 }
  0x18   : > { %s227_s8 = sand.u32 (!%p221_p7), 1, %s1517_s18   ;;  %p1280_p8 = scmp.ne.s32.totalorder (!%p221_p7), %s1575_s21, 0 }
  0x19   : > { %224 = sbr.rel (%p221_p7) target bundleno = 1555 (0x613), region = 74  ;;  %s1279_s9 = sshll.u32 (!%p221_p7), %s227_s8, 4 }
  0x1a   : > { %s229_s10 = scalar_lea.vmem (!%p221_p7), [#allocation4], %s1279_s9 }
  0x20   : > { %252 = sbr.rel (%p1280_p8) target bundleno = 39 (0x27), region = 82  ;;  %vm253_vm0 = vcmask (!%p1280_p8), 123904   ;;  %vm255_vm1 = vcmask (!%p1280_p8), 130048   ;;  %v1527_v2 = vmov (!%p1280_p8), 0.0  }
  0x21   : > { %254 = vst.msk [vmem:[#allocation2] sm:$0x3] (!%p1280_p8), %vm253_vm0, %v1527_v2 }
  0x22   : > { %256 = vst.msk [vmem:[#allocation3] sm:$0xff] (!%p1280_p8), %vm255_vm1, %v1527_v2  ;;  %257 = vst.msk [vmem:[#allocation3 + $0x8] sm:$0xff] (!%p1280_p8), %vm255_vm1, %v1527_v2 }
  0x23   : > { %258 = vst.msk [vmem:[#allocation3 + $0x10] sm:$0xff] (!%p1280_p8), %vm255_vm1, %v1527_v2  ;;  %259 = vst.msk [vmem:[#allocation3 + $0x18] sm:$0xff] (!%p1280_p8), %vm255_vm1, %v1527_v2 }
  0x24   : > { %260 = vst.msk [vmem:[#allocation3 + $0x20] sm:$0xff] (!%p1280_p8), %vm255_vm1, %v1527_v2  ;;  %261 = vst.msk [vmem:[#allocation3 + $0x28] sm:$0xff] (!%p1280_p8), %vm255_vm1, %v1527_v2 }
  0x25   : > { %262 = vst.msk [vmem:[#allocation3 + $0x30] sm:$0xff] (!%p1280_p8), %vm255_vm1, %v1527_v2  ;;  %263 = vst.msk [vmem:[#allocation3 + $0x38] sm:$0xff] (!%p1280_p8), %vm255_vm1, %v1527_v2 }
  0x27 PF: > { %v266_v3 = vld [vmem:[%s1691_s1] sm:$0xff]  ;;  %v267_v4 = vld [vmem:[%s1691_s1 + $0x8] sm:$0xff]  ;;  %vm275_vm2 = vcmask 130048   ;;  %v361_v11 = vld [vmem:[%s1693_s3 + $0x10] sm:$0xff]  ;;  %vm370_vm3 = vcmask 261120   ;;  %v452_v21 = vlaneseq  ;;  %s1287_s29 = sshll.u32 %s1575_s21, 3 }
  0x28   : > { %v264_v5 = vld [vmem:[%s229_s10] sm:$0xff]  ;;  %v1409_v6 = vpack.c.bf16 %v267_v4, %v266_v3  ;;  %v265_v10 = vld [vmem:[%s229_s10 + $0x8] sm:$0xff]  ;;  %v455_v23 = vstv %s1287_s29  ;;  %vm474_vm5 = vcmask 1040384   ;;  %vm478_vm6 = vcmask 123904   ;;  %p1300_p9 = scmp.ne.s32.totalorder %s1575_s21, 1 }
  0x29   : > { %1347 = vmatprep.mubr.msk.f32.mxu0 %vm275_vm2, %v264_v5  ;;  %v359_v7 = vld [vmem:[%s1693_s3] sm:$0xff]  ;;  %v360_v8 = vld [vmem:[%s1693_s3 + $0x8] sm:$0xff]  ;;  %v362_v12 = vld [vmem:[%s1693_s3 + $0x18] sm:$0xff]  ;;  %v453_v22 = vshrl.u32 %v452_v21, 7  ;;  %vm514_vm7 = vcmask 64512   ;;  %vm1529_vm8 = vmmov (!%p1300_p9), 0  }
  0x2a   : > { %v1413_v9 = vpack.c.bf16 %v360_v8, %v359_v7  ;;  %1410 = vmatprep.subr.bf16.mxu0 %v1409_v6  ;;  %v1417_v13 = vpack.c.bf16 %v362_v12, %v361_v11  ;;  %v1281_v14 = vld [vmem:[%s1692_s2] ss:$0 sm:$0xff]  ;;  %v481_v53 = vld [vmem:[#allocation3 + $0x8] sm:$0xff]  ;;  %v480_v54 = vld [vmem:[#allocation3] sm:$0xff]  ;;  %vm965_vm9 = vcmask (!%p1300_p9), 122880   ;;  %vm1047_vm10 = vcmask (!%p1300_p9), 7168  }
  0x2b   : > { %1412 = vmatpush3.bf16.msra.mxu0 %v1409_v6  ;;  %v456_v24 = vadd.s32 %v455_v23, %v453_v22  ;;  %v1284_v25 = vld [vmem:[%s1694_s4] ss:$0 sm:$0xff]  ;;  %v601_v60 = vld [vmem:[#allocation3 + $0x10] sm:$0xff]  ;;  %v684_v1 = vld [vmem:[#allocation3 + $0x28] sm:$0xff]  ;;  %vm1208_vm11 = vcmask (!%p1300_p9), 9216  }
  0x2c   : > { %1414 = vmatprep.subr.bf16.mxu1 %v1413_v9  ;;  %v476_v46 = vld [vmem:[#allocation2] sm:$0x3]  ;;  %v683_v3 = vld [vmem:[#allocation3 + $0x20] sm:$0xff]  ;;  %v803_v4 = vld [vmem:[#allocation3 + $0x30] sm:$0xff] }
  0x2d   : > { %1416 = vmatpush3.bf16.msra.mxu1 %v1413_v9  ;;  %vm457_vm4 = vcmp.lt.s32.totalorder %v456_v24, 12  ;;  %v602_v59 = vld [vmem:[#allocation3 + $0x18] sm:$0xff] }
  0x2e   : > { %1348 = vmatmul.mubr.msk.f32.vlgmr.msra.gmra.mrb[0].mxu0 %vm275_vm2, %v265_v10  ;;  %1418 = vmatprep.subr.bf16.mxu1 %v1417_v13  ;;  %v804_v2 = vld [vmem:[#allocation3 + $0x38] sm:$0xff] }
  0x31   : > { %1420 = vmatpush3.bf16.msra.mxu1 %v1417_v13 }
 0x101   : > { %v1349_v15 = vpop.f32.mrb[0].mxu0 }
 0x102   : > { %v354_v16 = vadd.f32 %v1349_v15, %v1281_v14  ;;  %v348_v17 = vpop.f32.mrb[1].mxu0 }
 0x103   : > { %v349_v18 = vadd.f32 %v1281_v14, %v348_v17 }
 0x104   : > { %v358_v20 = vmax.f32 %v354_v16, 0.0  ;;  %v1528_v16 = vmov (!%p1300_p9), 0.0|0.0  }
 0x105   : > { %v357_v19 = vmax.f32 %v349_v18, 0.0  ;;  %v1530_v18 = vmov (!%p1300_p9), 0.0  }
 0x107   : > { %1358 = vmatprep.mubr.msk.f32.mxu1 %vm370_vm3, %v357_v19 }
 0x108   : > { %1359 = vmatmul.mubr.msk.f32.vlgmr.msra.gmra.mrb[0].mxu1 %vm370_vm3, %v358_v20 }
 0x1db   : > { %v1360_v26 = vpop.f32.mrb[0].mxu1 }
 0x1dc   : > { %v449_v27 = vadd.f32 %v1360_v26, %v1284_v25  ;;  %v443_v28 = vpop.f32.mrb[1].mxu1 }
 0x1dd   : > { %v444_v29 = vadd.f32 %v1284_v25, %v443_v28 }
 0x1de   : > { %v459_v30 = vsel %vm457_vm4, %v449_v27, 0.0 }
 0x1df   : > { %1361 = vmatprep.subr.msk.mxu0 %vm457_vm4, %v444_v29  ;;  %1371 = vmatprep.subr.msk.mxu1 %vm457_vm4, %v444_v29  ;;  %v458_v31 = vsel %vm457_vm4, %v444_v29, 0.0  ;;  %v467_v32 = vsel %vm275_vm2, %v459_v30, 0.0 }
 0x1e0   : > { %1362 = vmatpush3.msk.msra.mxu0 %vm457_vm4, %v444_v29  ;;  %1372 = vmatpush3.msk.msra.mxu1 %vm457_vm4, %v444_v29  ;;  %v460_v33 = vsel %vm275_vm2, %v458_v31, 0.0  ;;  %v468_v34 = vrot.slane %v467_v32, 4 }
 0x1e1   : > { %482 = vxpose.xlu0.b32.start.end [1/1] (short) (narrow) %v458_v31, 16  ;;  %v461_v35 = vrot.slane %v460_v33, 4  ;;  %1366 = vmatprep.subr.msk.mxu0 %vm457_vm4, %v449_v27 }
 0x1e2   : > { %v469_v36 = vadd.f32 %v468_v34, %v467_v32  ;;  %1424 = vmatprep.subr.bf16.mxu1 (!%p1300_p9), %v1528_v16 }
 0x1e3   : > { %v462_v37 = vadd.f32 %v461_v35, %v460_v33 }
 0x1e4   : > { %v470_v38 = vrot.slane %v469_v36, 2 }
 0x1e5   : > { %v463_v39 = vrot.slane %v462_v37, 2 }
 0x1e6   : > { %v471_v40 = vadd.f32 %v470_v38, %v469_v36  ;;  %685 = vxpose.xlu0.b32.start.end [1/1] (short) (narrow) %v459_v30, 16 }
 0x1e7   : > { %v464_v41 = vadd.f32 %v463_v39, %v462_v37 }
 0x1e8   : > { %v472_v42 = vrot.slane %v471_v40, 1 }
 0x1e9   : > { %v465_v43 = vrot.slane %v464_v41, 1 }
 0x1ea   : > { %v473_v44 = vadd.f32 %v472_v42, %v471_v40 }
 0x1eb   : > { %v466_v45 = vadd.f32 %v465_v43, %v464_v41 }
 0x1ed   : > { %v475_v47 = vsel %vm474_vm5, %v466_v45, %v473_v44 }
 0x1ee   : > { %v477_v48 = vadd.f32 %v476_v46, %v475_v47 }
 0x1f0   : > { %479 = vst.msk [vmem:[#allocation2] sm:$0x3] %vm478_vm6, %v477_v48 }
 0x1f7   : > { %v888_v25 = vld [vmem:[#allocation2] sm:$0x3] (!%p1300_p9) }
 0x1f8   : > { %v1041_v28 = vrot.slane (!%p1300_p9), %v888_v25, 1 }
 0x261   : > { %v498_v49 = vpop.trf.xlu0 }
 0x262   : > { %1363 = vmatprep.mubr.msk.f32.mxu0 %vm514_vm7, %v498_v49 }
 0x265   : > { %v499_v50 = vpop.trf.xlu0 }
 0x266   : > { %1364 = vmatmul.mubr.msk.f32.vlgmr.msra.gmra.mrb[2].mxu0 %vm514_vm7, %v499_v50 }
 0x267   : > { %1367 = vmatpush3.msk.msra.mxu0 %vm457_vm4, %v449_v27  ;;  %1368 = vmatprep.mubr.msk.f32.mxu0 %vm514_vm7, %v498_v49 }
 0x268   : > { %1376 = vmatprep.subr.msk.mxu0 %vm457_vm4, %v449_v27 }
 0x269   : > { %v701_v51 = vpop.trf.xlu0 }
 0x26a   : > { %1369 = vmatmul.mubr.msk.f32.vlgmr.msra.gmra.mrb[4].mxu0 %vm514_vm7, %v499_v50  ;;  %1373 = vmatprep.mubr.msk.f32.mxu1 %vm514_vm7, %v701_v51 }
 0x26b   : > { %1377 = vmatpush3.msk.msra.mxu0 %vm457_vm4, %v449_v27  ;;  %1378 = vmatprep.mubr.msk.f32.mxu0 %vm514_vm7, %v701_v51 }
 0x26c   : > { %1421 = vmatprep.subr.bf16.mxu0 (!%p1300_p9), %v1528_v16 }
 0x26d   : > { %v702_v52 = vpop.trf.xlu0 }
 0x26e   : > { %1374 = vmatmul.mubr.msk.f32.vlgmr.msra.gmra.mrb[2].mxu1 %vm514_vm7, %v702_v52  ;;  %1379 = vmatmul.mubr.msk.f32.vlgmr.msra.gmra.mrb[6].mxu0 %vm514_vm7, %v702_v52 }
 0x26f   : > { %1385 = vmatprep.mubr.msk.f32.mxu0 (!%p1300_p9), %vm1529_vm8, %v1530_v18  ;;  %1392 = vmatprep.mubr.msk.f32.mxu1 (!%p1300_p9), %vm1529_vm8, %v1530_v18 }
 0x339   : > { %v1365_v55 = vpop.f32.mrb[2].mxu0 }
 0x33a   : > { %v597_v56 = vadd.f32 %v1365_v55, %v481_v53  ;;  %v587_v57 = vpop.f32.mrb[3].mxu0 }
 0x33b   : > { %v596_v58 = vadd.f32 %v587_v57, %v480_v54 }
 0x33c   : > { %599 = vst.msk [vmem:[#allocation3 + $0x8] sm:$0xff] %vm275_vm2, %v597_v56 }
 0x33d   : > { %598 = vst.msk [vmem:[#allocation3] sm:$0xff] %vm275_vm2, %v596_v58  ;;  %v1370_v61 = vpop.f32.mrb[4].mxu0 }
 0x33e   : > { %v679_v62 = vadd.f32 %v1370_v61, %v602_v59  ;;  %v669_v63 = vpop.f32.mrb[5].mxu0 }
 0x33f   : > { %v678_v0 = vadd.f32 %v669_v63, %v601_v60  ;;  %887 = sbr.rel (%p1300_p9) target bundleno = 1530 (0x5fa), region = 86 }
 0x340   : > { %681 = vst.msk [vmem:[#allocation3 + $0x18] sm:$0xff] %vm275_vm2, %v679_v62 }
 0x341   : > { %680 = vst.msk [vmem:[#allocation3 + $0x10] sm:$0xff] %vm275_vm2, %v678_v0  ;;  %v1375_v5 = vpop.f32.mrb[2].mxu1  ;;  %v1380_v6 = vpop.f32.mrb[6].mxu0 }
 0x342   : > { %v799_v7 = vadd.f32 %v1375_v5, %v684_v1  ;;  %v881_v8 = vadd.f32 %v1380_v6, %v804_v2  ;;  %v789_v9 = vpop.f32.mrb[3].mxu1  ;;  %v871_v10 = vpop.f32.mrb[7].mxu0 }
 0x343   : > { %v798_v11 = vadd.f32 %v789_v9, %v683_v3  ;;  %v880_v12 = vadd.f32 %v871_v10, %v803_v4  ;;  %v890_v14 = vld [vmem:[#allocation3 + $0x8] sm:$0xff] (!%p1300_p9) }
 0x344   : > { %801 = vst.msk [vmem:[#allocation3 + $0x28] sm:$0xff] %vm275_vm2, %v799_v7  ;;  %883 = vst.msk [vmem:[#allocation3 + $0x38] sm:$0xff] %vm275_vm2, %v881_v8  ;;  %v889_v13 = vld [vmem:[#allocation3] sm:$0xff] (!%p1300_p9) }
 0x345   : > { %800 = vst.msk [vmem:[#allocation3 + $0x20] sm:$0xff] %vm275_vm2, %v798_v11  ;;  %882 = vst.msk [vmem:[#allocation3 + $0x30] sm:$0xff] %vm275_vm2, %v880_v12  ;;  %v1422_v17 = vpack.c.bf16 (!%p1300_p9), %v890_v14, %v889_v13 }
 0x347   : > { %v970_v19 = vld [vmem:[#allocation3 + $0x18] sm:$0xff]  ;;  %1423 = vmatpush3.bf16.msra.mxu0 %v1422_v17 }
 0x348   : > { %v969_v15 = vld [vmem:[#allocation3 + $0x10] sm:$0xff]  ;;  %1427 = vmatprep.subr.bf16.mxu0 %v1528_v16 }
 0x349   : > { %v1425_v21 = vpack.c.bf16 %v970_v19, %v969_v15 }
 0x34a   : > { %1386 = vmatmul.mubr.msk.f32.vlgmr.msra.gmra.mrb[0].mxu0 %vm275_vm2, %v888_v25 }
 0x34b   : > { %v1050_v22 = vld [vmem:[#allocation3 + $0x28] sm:$0xff]  ;;  %v1128_v24 = vld [vmem:[#allocation3 + $0x38] sm:$0xff]  ;;  %1426 = vmatpush3.bf16.msra.mxu1 %v1425_v21  ;;  %1399 = vmatprep.mubr.msk.f32.mxu0 %vm1529_vm8, %v1530_v18 }
 0x34c   : > { %v1049_v20 = vld [vmem:[#allocation3 + $0x20] sm:$0xff]  ;;  %v1127_v23 = vld [vmem:[#allocation3 + $0x30] sm:$0xff]  ;;  %1430 = vmatprep.subr.bf16.mxu1 %v1528_v16 }
 0x34d   : > { %v1428_v26 = vpack.c.bf16 %v1050_v22, %v1049_v20  ;;  %v1431_v27 = vpack.c.bf16 %v1128_v24, %v1127_v23 }
 0x34e   : > { %1393 = vmatmul.mubr.msk.f32.vlgmr.msra.gmra.mrb[0].mxu1 %vm275_vm2, %v888_v25 }
 0x34f   : > { %1429 = vmatpush3.bf16.msra.mxu0 %v1428_v26  ;;  %1432 = vmatpush3.bf16.msra.mxu1 %v1431_v27 }
 0x350   : > { %1406 = vmatprep.mubr.msk.f32.mxu1 %vm1529_vm8, %v1530_v18 }
 0x352   : > { %1400 = vmatmul.mubr.msk.f32.vlgmr.msra.gmra.mrb[2].mxu0 %vm275_vm2, %v1041_v28  ;;  %1407 = vmatmul.mubr.msk.f32.vlgmr.msra.gmra.mrb[2].mxu1 %vm275_vm2, %v1041_v28 }
 0x41d   : > { %v960_v29 = vpop.f32.mrb[0].mxu0 }
 0x41e   : > { %v964_v30 = vmul.f32 %v960_v29, %v888_v25  ;;  %v1387_v31 = vpop.f32.mrb[1].mxu0 }
 0x420   : > { %v966_v34 = vsel %vm965_vm9, %v964_v30, 0.0 }
 0x421   : > { %v1037_v32 = vpop.f32.mrb[0].mxu1  ;;  %967 = vadd.xlane.f32.xlu1 %v966_v34 }
 0x422   : > { %v1043_v33 = vmul.f32 %v1041_v28, %v1037_v32  ;;  %v1394_v35 = vpop.f32.mrb[1].mxu1 }
 0x424   : > { %v1044_v39 = vsel %vm965_vm9, %v1043_v33, 0.0 }
 0x425   : > { %v1119_v36 = vpop.f32.mrb[2].mxu0  ;;  %v1195_v40 = vpop.f32.mrb[2].mxu1  ;;  %1045 = vadd.xlane.f32.xlu1 %v1044_v39 }
 0x426   : > { %v1123_v37 = vmul.f32 %v1119_v36, %v888_v25  ;;  %v1401_v38 = vpop.f32.mrb[3].mxu0  ;;  %v1199_v41 = vmul.f32 %v1195_v40, %v1041_v28  ;;  %v1408_v43 = vpop.f32.mrb[3].mxu1 }
 0x428   : > { %v1124_v42 = vsel %vm965_vm9, %v1123_v37, 0.0  ;;  %v1200_v44 = vsel %vm965_vm9, %v1199_v41, 0.0 }
 0x429   : > { %1125 = vadd.xlane.f32.xlu0 %v1124_v42 }
 0x42d   : > { %1201 = vadd.xlane.f32.xlu0 %v1200_v44 }
 0x4ae   : > { %v968_v45 = vpop.xlane.xlu1 %967 }
 0x4b2   : > { %v1046_v47 = vpop.xlane.xlu1 %1045 }
 0x4b3   : > { %v1048_v51 = vsel %vm1047_vm10, %v968_v45, %v1046_v47 }
 0x4b6   : > { %v1126_v46 = vpop.xlane.xlu0 %1125 }
 0x4ba   : > { %v1202_v48 = vpop.xlane.xlu0 %1201 }
 0x4bb   : > { %v1203_v49 = vsel %vm1047_vm10, %v1126_v46, %v1202_v48 }
 0x4bc   : > { %v1205_v50 = vrot.slane %v1203_v49, 7 }
 0x4be   : > { %v1207_v52 = vsel %vm474_vm5, %v1048_v51, %v1205_v50 }
 0x4bf   : > { %v1209_v53 = vsel %vm1208_vm11, %v1207_v52, -inf }
 0x4c0   : > { %1210 = vmax.xlane.f32.xlu0 %v1209_v53 }
 0x54d   : > { %v1211_v54 = vpop.xlane.xlu0 %1210 }
 0x54e   : > { %v1212_v55 = vsub.f32 %v1207_v52, %v1211_v54 }
 0x550   : > { %v1213_v56 = vmul.f32 1.442695, %v1212_v55 }
 0x552   : > { %1469 = vpow2.f32 %v1213_v56 }
 0x55c   : > { %v1470_v57 = vpop.eup %1469 }
 0x55d   : > { %v1215_v58 = vsel %vm1208_vm11, %v1470_v57, 0.0 }
 0x55e   : > { %1216 = vadd.xlane.f32.xlu1 %v1215_v58 }
 0x5eb   : > { %v1217_v59 = vpop.xlane.xlu1 %1216 }
 0x5ec   : > { %1471 = vrcp.f32 %v1217_v59 }
 0x5f6   : > { %v1472_v60 = vpop.eup %1471 }
 0x5f7   : > { %v1219_v61 = vmul.f32 %v1472_v60, %v1470_v57 }
 0x5f9   : > { %1220 = vst.msk [vmem:[#allocation5] sm:$0x3] %vm1208_vm11, %v1219_v61 }
 0x5fa PF: > { %p1437_p10 = scmp.eq.s32.totalorder %s1575_s21, 1  ;;  %s1531_s7 = smov [#allocation5]  }
 0x5fb   : > { %s1228_s8 = sshll.u32 %s1531_s7, 4  ;;  %s1229_s8 = int_to_ptr.vmem [resolvable:$true] %s1228_s8 }
 0x5fc   : > { %s1473_s9 = scalar_lea.vmem %s1229_s8, 32  ;;  %p1480_p0 = scmp.lt.s32.totalorder %s1229_s8, %s1229_s8 }
 0x5fd   : > { %p1474_p11 = scmp.ne.s32.totalorder %s1229_s8, %s1473_s9  ;;  %p1481_p1 = scmp.lt.s32.totalorder %s1473_s9, %s1473_s9 }
 0x5ff   : > { %p1475_p12 = pnand %p1474_p11, %p1437_p10  ;;  %p1482_p2 = por %p1481_p1, %p1480_p0 }
 0x601   : > { %p1476_p13 = pneg %p1475_p12 }
 0x603   : > { %p1483_p3 = pnand %p1482_p2, %p1476_p13 }
 0x605   : > { %1486 = shalt.err (!%p1483_p3)
}
 0x606   : > { %s1487_s12 = scalar_lea.hbm %s1695_s5, 32 }
 0x607   : > { %p1488_p4 = scmp.ne.s32.totalorder %s1695_s5, %s1487_s12  ;;  %p1493_p7 = scmp.lt.u32.totalorder %s1487_s12, %s1695_s5 }
 0x609   : > { %p1489_p5 = pnand %p1488_p4, %p1437_p10 }
 0x60b   : > { %p1490_p6 = pneg %p1489_p5 }
 0x60d   : > { %p1495_p8 = pnand %p1493_p7, %p1490_p6 }
 0x60f   : > { %1498 = shalt.err (!%p1495_p8)
}
 0x610   : > { %1434 = dma.vmem_to_hbm [thread:$0]  (%p1437_p10), %s1229_s8, 32, %s1695_s5, [#allocation6]  }
 0x611   : > { %1512 = dma.done.wait (%p1437_p10), [#allocation6], 32  }
 0x612   : > { %1514 = vsyncadd (%p1437_p10), [#allocation6], 4294967264 }
 0x613 PF: > { %p13_p9 = scmp.ge.s32.totalorder %s1577_s22, 4   ;;  %s1696_s18 = smov %s1521_s19 }
 0x614   : > { %s1697_s19 = smov %s1584_s25  ;;  %s1698_s20 = smov %s1577_s22 }
 0x615   :  { %15 = sbr.rel (!%p13_p9) target bundleno = 2 (0x2), region = 121 }
 0x61c   :  { %1241 = vsyncpa [#allocation6], 1 }
 0x61d   :  { %1243 = vsyncpa [#allocation6 + $0x1], 1 }

</bundles_post_ra>
